<compile_context>
chip_gen: v7x
topology: tpu7x:2x2x1
jax: 0.10.0
libtpu: 0.0.40
codegen_flags: <defaults>
</compile_context>

<pallas_src>
import jax
import jax.numpy as jnp
from jax import lax
from jax.experimental import pallas as pl
from jax.experimental.pallas import tpu as pltpu

CIN = 3
COUT = 32
KH = KW = 3
KPAD = 32          # contraction dim 27 zero-padded to 32 for aligned tiles


# ---------------------------------------------------------------------------
# Kernel: one im2col matmul per image in the batch block.
#   col_ref : (B_BLK, KPAD, H*W)   lane-dense columns
#   w_ref   : (COUT, KPAD)         im2col weight matrix
#   out_ref : (B_BLK, COUT, H*W)   lane-dense conv output (NCHW w/ flat spatial)
# ---------------------------------------------------------------------------
def conv_kernel(col_ref, w_ref, out_ref):
    wk = w_ref[...]                                  # (COUT, KPAD)
    for b in range(col_ref.shape[0]):                # static unroll (<= 8)
        out_ref[b] = jnp.dot(wk, col_ref[b],
                             preferred_element_type=jnp.float32)


@jax.jit
def model_forward(x, w):
    """x: (N, 3, H, W) f32, w: (32, 3, 3, 3) f32 -> (N, 32, H, W) f32."""
    N, cin, H, Wd = x.shape
    HW = H * Wd
    K = cin * KH * KW                                # 27

    # ---- glue: im2col (pad + 9 shifted views), lane-dense last dim ---------
    xp = jnp.pad(x, ((0, 0), (0, 0), (1, 1), (1, 1)))          # (N, 3, H+2, W+2)
    cols = jnp.stack([xp[:, :, kh:kh + H, kw:kw + Wd]
                      for kh in range(KH) for kw in range(KW)],
                     axis=2)                                    # (N, 3, 9, H, W)
    cols = cols.reshape(N, K, HW)                               # (N, 27, H*W)
    cols = jnp.pad(cols, ((0, 0), (0, KPAD - K), (0, 0)))       # (N, 32, H*W)
    w_mat = jnp.pad(w.reshape(COUT, K), ((0, 0), (0, KPAD - K)))  # (32, 32)

    # ---- batch blocking: several images per grid step ----------------------
    b_blk = min(8, N)
    n_pad = (-N) % b_blk
    if n_pad:
        cols = jnp.pad(cols, ((0, n_pad), (0, 0), (0, 0)))
    n_total = N + n_pad

    out_flat = pl.pallas_call(
        conv_kernel,
        out_shape=jax.ShapeDtypeStruct((n_total, COUT, HW), jnp.float32),
        grid=(n_total // b_blk,),
        in_specs=[
            pl.BlockSpec((b_blk, KPAD, HW), lambda i: (i, 0, 0)),
            pl.BlockSpec((COUT, KPAD), lambda i: (0, 0)),
        ],
        out_specs=pl.BlockSpec((b_blk, COUT, HW), lambda i: (i, 0, 0)),
        compiler_params=pltpu.CompilerParams(
            dimension_semantics=("parallel",)),
    )(cols, w_mat)

    # trailing-dim reshape only (no transpose): (N, COUT, H*W) -> (N, COUT, H, W)
    return out_flat[:N].reshape(N, COUT, H, Wd)


if __name__ == "__main__":
    key = jax.random.PRNGKey(0)
    kx, kw = jax.random.split(key)

    N, H, W = 2, 32, 32
    x = jax.random.normal(kx, (N, CIN, H, W), dtype=jnp.float32)
    fan_in = CIN * KH * KW
    bound = 1.0 / (fan_in ** 0.5)                    # PyTorch default conv init range
    w = jax.random.uniform(kw, (COUT, CIN, KH, KW), dtype=jnp.float32,
                           minval=-bound, maxval=bound)

    out = model_forward(x, w)
    jax.block_until_ready(out)

    # Pure-JAX reference (mirrors the PyTorch forward exactly).
    ref = lax.conv_general_dilated(x, w, (1, 1), 'SAME',
                                   dimension_numbers=('NCHW', 'OIHW', 'NCHW'),
                                   precision=lax.Precision.HIGHEST)

    assert out.shape == (N, COUT, H, W), out.shape
    max_err = float(jnp.max(jnp.abs(out - ref)))
    assert jnp.allclose(out, ref, atol=2e-2, rtol=2e-2), max_err
    print("KERNEL_OK")
</pallas_src>

<mosaic_0001>
module attributes {stable_mosaic.version = 11 : i64} {
  func.func @conv_kernel(%arg0: i32, %arg1: memref<2x32x1024xf32, #tpu.memory_space<vmem>>, %arg2: memref<32x32xf32, #tpu.memory_space<vmem>>, %arg3: memref<2x32x1024xf32, #tpu.memory_space<vmem>>) attributes {dimension_semantics = [#tpu.dimension_semantics<parallel>], iteration_bounds = array<i64: 1>, scalar_prefetch = 0 : i64, scratch_operands = 0 : i64, tpu.core_type = #tpu.core_type<tc>, window_params = [{transform_indices = @transform_0, window_bounds = array<i64: 2, 32, 1024>}, {pipeline_mode = #tpu.pipeline_mode<synchronous>, transform_indices = @transform_1, window_bounds = array<i64: 32, 32>}, {transform_indices = @transform_2, window_bounds = array<i64: 2, 32, 1024>}]} {
    %c0 = arith.constant 0 : index
    %c0_0 = arith.constant 0 : index
    %0 = vector.load %arg2[%c0, %c0_0] : memref<32x32xf32, #tpu.memory_space<vmem>>, vector<32x32xf32>
    %c0_1 = arith.constant 0 : index
    %c0_2 = arith.constant 0 : index
    %c0_3 = arith.constant 0 : index
    %1 = vector.load %arg1[%c0_1, %c0_2, %c0_3] : memref<2x32x1024xf32, #tpu.memory_space<vmem>>, vector<1x32x1024xf32>
    %2 = vector.shape_cast %1 : vector<1x32x1024xf32> to vector<32x1024xf32>
    %cst = arith.constant dense<0.000000e+00> : vector<32x1024xf32>
    %3 = tpu.matmul %0, %2, %cst {dimension_numbers = #tpu.dot_dimension_numbers<[1], [0], [0], [1], [0, 0, 1, 1], [], []>} : vector<32x32xf32>, vector<32x1024xf32>, vector<32x1024xf32> -> vector<32x1024xf32>
    %c0_4 = arith.constant 0 : index
    %c0_5 = arith.constant 0 : index
    %c0_6 = arith.constant 0 : index
    %4 = vector.load %arg3[%c0_4, %c0_5, %c0_6] : memref<2x32x1024xf32, #tpu.memory_space<vmem>>, vector<1x32x1024xf32>
    %5 = vector.shape_cast %4 : vector<1x32x1024xf32> to vector<32x1024xf32>
    %6 = vector.shape_cast %3 : vector<32x1024xf32> to vector<1x32x1024xf32>
    tpu.vector_store %arg3[%c0_4, %c0_5, %c0_6], %6 {strides = array<i32>} : memref<2x32x1024xf32, #tpu.memory_space<vmem>>, vector<1x32x1024xf32>,
    %c1 = arith.constant 1 : index
    %c0_7 = arith.constant 0 : index
    %c0_8 = arith.constant 0 : index
    %7 = vector.load %arg1[%c1, %c0_7, %c0_8] : memref<2x32x1024xf32, #tpu.memory_space<vmem>>, vector<1x32x1024xf32>
    %8 = vector.shape_cast %7 : vector<1x32x1024xf32> to vector<32x1024xf32>
    %cst_9 = arith.constant dense<0.000000e+00> : vector<32x1024xf32>
    %9 = tpu.matmul %0, %8, %cst_9 {dimension_numbers = #tpu.dot_dimension_numbers<[1], [0], [0], [1], [0, 0, 1, 1], [], []>} : vector<32x32xf32>, vector<32x1024xf32>, vector<32x1024xf32> -> vector<32x1024xf32>
    %c1_10 = arith.constant 1 : index
    %c0_11 = arith.constant 0 : index
    %c0_12 = arith.constant 0 : index
    %10 = vector.load %arg3[%c1_10, %c0_11, %c0_12] : memref<2x32x1024xf32, #tpu.memory_space<vmem>>, vector<1x32x1024xf32>
    %11 = vector.shape_cast %10 : vector<1x32x1024xf32> to vector<32x1024xf32>
    %12 = vector.shape_cast %9 : vector<32x1024xf32> to vector<1x32x1024xf32>
    tpu.vector_store %arg3[%c1_10, %c0_11, %c0_12], %12 {strides = array<i32>} : memref<2x32x1024xf32, #tpu.memory_space<vmem>>, vector<1x32x1024xf32>,
    return
  }
  func.func @transform_0(%arg0: i32) -> (i32, i32, i32) {
    %c0_i32 = arith.constant 0 : i32
    %c0_i32_0 = arith.constant 0 : i32
    %c0_i32_1 = arith.constant 0 : i32
    return %arg0, %c0_i32, %c0_i32_0 : i32, i32, i32
  }
  func.func @transform_1(%arg0: i32) -> (i32, i32) {
    %c0_i32 = arith.constant 0 : i32
    %c0_i32_0 = arith.constant 0 : i32
    %c0_i32_1 = arith.constant 0 : i32
    return %c0_i32, %c0_i32_0 : i32, i32
  }
  func.func @transform_2(%arg0: i32) -> (i32, i32, i32) {
    %c0_i32 = arith.constant 0 : i32
    %c0_i32_0 = arith.constant 0 : i32
    %c0_i32_1 = arith.constant 0 : i32
    return %arg0, %c0_i32, %c0_i32_0 : i32, i32, i32
  }
}

</mosaic_0001>

<bundles_post_ra>
// kernel: model_forward.1
= control target key start
LH: loop header
LB: loop body
LE: loop exit
PB: predicated region body
PF: predicated region fallthrough
CT: control target
= control target key end

     0   :  { %v1035_v3 = vmov 0.0   ;;  %vm47_vm0 = vcmask 261120   ;;  %s1551_s0 = inlined_call_operand.vmem [shape: f32[2,32,1024], index: 0, kind: input, shape index: {}]   ;;  %s1552_s1 = inlined_call_operand.vmem [shape: f32[32,32], index: 1, kind: input, shape index: {}]   ;;  %s1553_s2 = inlined_call_operand.vmem [shape: f32[2,32,1024], index: 2, kind: output, shape index: {}]  }
   0x1   :  { %v16_v0 = vld [vmem:[%s1551_s0 + $0x8] sm:$0xff]  ;;  %v18_v2 = vld [vmem:[%s1551_s0 + $0x18] sm:$0xff]  ;;  %124 = vmatprep.mubr.f32.mxu0 %v1035_v3  ;;  %213 = vmatprep.mubr.f32.mxu1 %v1035_v3  ;;  %v15_v6 = vld [vmem:[%s1551_s0] sm:$0xff] }
   0x2   :  { %v24_v1 = vld [vmem:[%s1551_s0 + $0x48] sm:$0xff]  ;;  %v26_v5 = vld [vmem:[%s1551_s0 + $0x58] sm:$0xff]  ;;  %v23_v7 = vld [vmem:[%s1551_s0 + $0x40] sm:$0xff] }
   0x3   :  { %v970_v4 = vpack.c.bf16 %v24_v1, %v16_v0  ;;  %v978_v8 = vpack.c.bf16 %v26_v5, %v18_v2  ;;  %v972_v9 = vpack.c.bf16 %v23_v7, %v15_v6  ;;  %v17_v10 = vld [vmem:[%s1551_s0 + $0x10] sm:$0xff]  ;;  %v32_v12 = vld [vmem:[%s1551_s0 + $0x88] sm:$0xff]  ;;  %v34_v15 = vld [vmem:[%s1551_s0 + $0x98] sm:$0xff] }
   0x4   :  { %v25_v11 = vld [vmem:[%s1551_s0 + $0x50] sm:$0xff]  ;;  %v40_v14 = vld [vmem:[%s1551_s0 + $0xc8] sm:$0xff]  ;;  %v42_v16 = vld [vmem:[%s1551_s0 + $0xd8] sm:$0xff] }
   0x5   :  { %971 = vmatprep.subr.bf16.mxu0 %v970_v4  ;;  %v980_v13 = vpack.c.bf16 %v25_v11, %v17_v10  ;;  %979 = vmatprep.subr.bf16.mxu1 %v978_v8  ;;  %v974_v17 = vpack.c.bf16 %v40_v14, %v32_v12  ;;  %v982_v18 = vpack.c.bf16 %v42_v16, %v34_v15  ;;  %v31_v19 = vld [vmem:[%s1551_s0 + $0x80] sm:$0xff]  ;;  %v33_v21 = vld [vmem:[%s1551_s0 + $0x90] sm:$0xff]  ;;  %v20_v24 = vld [vmem:[%s1551_s0 + $0x28] sm:$0xff] }
   0x6   :  { %973 = vmatpush1.bf16.msra.mxu0 %v972_v9  ;;  %v39_v20 = vld [vmem:[%s1551_s0 + $0xc0] sm:$0xff]  ;;  %v41_v23 = vld [vmem:[%s1551_s0 + $0xd0] sm:$0xff]  ;;  %v28_v26 = vld [vmem:[%s1551_s0 + $0x68] sm:$0xff] }
   0x7   :  { %981 = vmatpush1.bf16.msra.mxu1 %v980_v13  ;;  %v976_v22 = vpack.c.bf16 %v39_v20, %v31_v19  ;;  %975 = vmatprep.subr.bf16.mxu0 %v974_v17  ;;  %v984_v25 = vpack.c.bf16 %v41_v23, %v33_v21  ;;  %v22_v27 = vld [vmem:[%s1551_s0 + $0x38] sm:$0xff]  ;;  %v986_v29 = vpack.c.bf16 %v28_v26, %v20_v24  ;;  %v19_v31 = vld [vmem:[%s1551_s0 + $0x20] sm:$0xff]  ;;  %v21_v33 = vld [vmem:[%s1551_s0 + $0x30] sm:$0xff] }
   0x8   :  { %983 = vmatprep.subr.bf16.mxu1 %v982_v18  ;;  %v30_v28 = vld [vmem:[%s1551_s0 + $0x78] sm:$0xff]  ;;  %v27_v32 = vld [vmem:[%s1551_s0 + $0x60] sm:$0xff]  ;;  %v29_v36 = vld [vmem:[%s1551_s0 + $0x70] sm:$0xff] }
   0x9   :  { %v994_v30 = vpack.c.bf16 %v30_v28, %v22_v27  ;;  %v1125_v34 = vld [vmem:[%s1552_s1] sm:$0xff]  ;;  %v988_v35 = vpack.c.bf16 %v27_v32, %v19_v31  ;;  %v996_v37 = vpack.c.bf16 %v29_v36, %v21_v33  ;;  %v36_v38 = vld [vmem:[%s1551_s0 + $0xa8] sm:$0xff]  ;;  %v38_v40 = vld [vmem:[%s1551_s0 + $0xb8] sm:$0xff] }
   0xa   :  { %977 = vmatpush1.bf16.msra.mxu0 %v976_v22  ;;  %v44_v39 = vld [vmem:[%s1551_s0 + $0xe8] sm:$0xff]  ;;  %v46_v42 = vld [vmem:[%s1551_s0 + $0xf8] sm:$0xff]  ;;  %v35_v43 = vld [vmem:[%s1551_s0 + $0xa0] sm:$0xff] }
   0xb   :  { %985 = vmatpush1.bf16.msra.mxu1 %v984_v25  ;;  %987 = vmatprep.subr.bf16.mxu0 %v986_v29  ;;  %v990_v41 = vpack.c.bf16 %v44_v39, %v36_v38  ;;  %v43_v44 = vld [vmem:[%s1551_s0 + $0xe0] sm:$0xff]  ;;  %v1153_v45 = vld [vmem:[%s1552_s1 + $0x8] sm:$0xff]  ;;  %v998_v46 = vpack.c.bf16 %v46_v42, %v38_v40  ;;  %v37_v47 = vld [vmem:[%s1551_s0 + $0xb0] sm:$0xff] }
   0xc   :  { %995 = vmatprep.subr.bf16.mxu1 %v994_v30  ;;  %v45_v48 = vld [vmem:[%s1551_s0 + $0xf0] sm:$0xff]  ;;  %v891_v49 = vld [vmem:[%s1551_s0 + $0x108] sm:$0xff]  ;;  %v893_v51 = vld [vmem:[%s1551_s0 + $0x118] sm:$0xff]  ;;  %v992_v52 = vpack.c.bf16 %v43_v44, %v35_v43 }
   0xd   :  { %874 = vmatmul.mubr.msk.f32.vlgmr.msra.gmra.mrb[0].mxu0 %vm47_vm0, %v1125_v34  ;;  %v899_v50 = vld [vmem:[%s1551_s0 + $0x148] sm:$0xff]  ;;  %v901_v53 = vld [vmem:[%s1551_s0 + $0x158] sm:$0xff]  ;;  %v1000_v54 = vpack.c.bf16 %v45_v48, %v37_v47  ;;  %v1185_v57 = vld [vmem:[%s1552_s1 + $0x10] sm:$0xff] }
   0xe   :  { %878 = vmatmul.mubr.msk.f32.vlgmr.msra.gmra.mrb[0].mxu1 %vm47_vm0, %v1125_v34  ;;  %989 = vmatpush1.bf16.msra.mxu0 %v988_v35  ;;  %v1002_v55 = vpack.c.bf16 %v899_v50, %v891_v49  ;;  %v1010_v56 = vpack.c.bf16 %v901_v53, %v893_v51  ;;  %v1196_v58 = vld [vmem:[%s1552_s1 + $0x18] sm:$0xff]  ;;  %v890_v59 = vld [vmem:[%s1551_s0 + $0x100] sm:$0xff]  ;;  %v892_v61 = vld [vmem:[%s1551_s0 + $0x110] sm:$0xff] }
   0xf   :  { %997 = vmatpush1.bf16.msra.mxu1 %v996_v37  ;;  %130 = vmatprep.mubr.f32.mxu0 %v1035_v3  ;;  %v898_v60 = vld [vmem:[%s1551_s0 + $0x140] sm:$0xff]  ;;  %v900_v62 = vld [vmem:[%s1551_s0 + $0x150] sm:$0xff]  ;;  %v907_v63 = vld [vmem:[%s1551_s0 + $0x188] sm:$0xff] }
  0x10   :  { %219 = vmatprep.mubr.f32.mxu1 %v1035_v3  ;;  %991 = vmatprep.subr.bf16.mxu0 %v990_v41  ;;  %v915_v0 = vld [vmem:[%s1551_s0 + $0x1c8] sm:$0xff]  ;;  %v1004_v1 = vpack.c.bf16 %v898_v60, %v890_v59  ;;  %v909_v2 = vld [vmem:[%s1551_s0 + $0x198] sm:$0xff]  ;;  %v1012_v5 = vpack.c.bf16 %v900_v62, %v892_v61  ;;  %v906_v7 = vld [vmem:[%s1551_s0 + $0x180] sm:$0xff] }
  0x11   :  { %875 = vmatmul.mubr.msk.f32.gmra.mrb[2].mxu0 %vm47_vm0, %v1153_v45  ;;  %999 = vmatprep.subr.bf16.mxu1 %v998_v46  ;;  %v917_v4 = vld [vmem:[%s1551_s0 + $0x1d8] sm:$0xff]  ;;  %v1006_v6 = vpack.c.bf16 %v915_v0, %v907_v63  ;;  %v914_v8 = vld [vmem:[%s1551_s0 + $0x1c0] sm:$0xff]  ;;  %v908_v9 = vld [vmem:[%s1551_s0 + $0x190] sm:$0xff] }
  0x12   :  { %879 = vmatmul.mubr.msk.f32.gmra.mrb[2].mxu1 %vm47_vm0, %v1153_v45  ;;  %136 = vmatprep.mubr.f32.mxu0 %v1035_v3  ;;  %v1014_v10 = vpack.c.bf16 %v917_v4, %v909_v2  ;;  %v916_v11 = vld [vmem:[%s1551_s0 + $0x1d0] sm:$0xff]  ;;  %v895_v12 = vld [vmem:[%s1551_s0 + $0x128] sm:$0xff]  ;;  %v897_v14 = vld [vmem:[%s1551_s0 + $0x138] sm:$0xff]  ;;  %v1008_v16 = vpack.c.bf16 %v914_v8, %v906_v7 }
  0x13   :  { %225 = vmatprep.mubr.f32.mxu1 %v1035_v3  ;;  %993 = vmatpush1.bf16.msra.mxu0 %v992_v52  ;;  %v903_v13 = vld [vmem:[%s1551_s0 + $0x168] sm:$0xff]  ;;  %v905_v15 = vld [vmem:[%s1551_s0 + $0x178] sm:$0xff]  ;;  %v1016_v17 = vpack.c.bf16 %v916_v11, %v908_v9  ;;  %v894_v20 = vld [vmem:[%s1551_s0 + $0x120] sm:$0xff] }
  0x14   :  { %1001 = vmatpush1.bf16.msra.mxu1 %v1000_v54  ;;  %1003 = vmatprep.subr.bf16.mxu0 %v1002_v55  ;;  %v1018_v18 = vpack.c.bf16 %v903_v13, %v895_v12  ;;  %v1026_v19 = vpack.c.bf16 %v905_v15, %v897_v14  ;;  %v902_v21 = vld [vmem:[%s1551_s0 + $0x160] sm:$0xff]  ;;  %v896_v22 = vld [vmem:[%s1551_s0 + $0x130] sm:$0xff]  ;;  %v911_v24 = vld [vmem:[%s1551_s0 + $0x1a8] sm:$0xff] }
  0x15   :  { %876 = vmatmul.mubr.msk.f32.gmra.mrb[4].mxu0 %vm47_vm0, %v1185_v57  ;;  %1011 = vmatprep.subr.bf16.mxu1 %v1010_v56  ;;  %v904_v23 = vld [vmem:[%s1551_s0 + $0x170] sm:$0xff]  ;;  %v919_v25 = vld [vmem:[%s1551_s0 + $0x1e8] sm:$0xff]  ;;  %v1020_v26 = vpack.c.bf16 %v902_v21, %v894_v20  ;;  %v913_v27 = vld [vmem:[%s1551_s0 + $0x1b8] sm:$0xff] }
  0x16   :  { %880 = vmatmul.mubr.msk.f32.gmra.mrb[4].mxu1 %vm47_vm0, %v1185_v57  ;;  %142 = vmatprep.mubr.f32.mxu0 %v1035_v3  ;;  %v921_v28 = vld [vmem:[%s1551_s0 + $0x1f8] sm:$0xff]  ;;  %v1028_v29 = vpack.c.bf16 %v904_v23, %v896_v22  ;;  %v1022_v30 = vpack.c.bf16 %v919_v25, %v911_v24  ;;  %v910_v31 = vld [vmem:[%s1551_s0 + $0x1a0] sm:$0xff]  ;;  %v912_v35 = vld [vmem:[%s1551_s0 + $0x1b0] sm:$0xff] }
  0x17   :  { %231 = vmatprep.mubr.f32.mxu1 %v1035_v3  ;;  %v918_v32 = vld [vmem:[%s1551_s0 + $0x1e0] sm:$0xff]  ;;  %v1030_v33 = vpack.c.bf16 %v921_v28, %v913_v27  ;;  %v920_v36 = vld [vmem:[%s1551_s0 + $0x1f0] sm:$0xff] }
  0x18   :  { %v1024_v37 = vpack.c.bf16 %v918_v32, %v910_v31  ;;  %v1032_v38 = vpack.c.bf16 %v920_v36, %v912_v35 }
  0x19   :  { %877 = vmatmul.mubr.msk.f32.gmra.mrb[6].mxu0 %vm47_vm0, %v1196_v58 }
  0x1a   :  { %881 = vmatmul.mubr.msk.f32.gmra.mrb[6].mxu1 %vm47_vm0, %v1196_v58  ;;  %302 = vmatprep.mubr.f32.mxu0 %v1035_v3 }
  0x1b   :  { %391 = vmatprep.mubr.f32.mxu1 %v1035_v3 }
  0x1d   :  { %882 = vmatmul.mubr.msk.f32.vlgmr.msra.gmra.mrb[8].mxu0 %vm47_vm0, %v1125_v34 }
  0x1e   :  { %886 = vmatmul.mubr.msk.f32.vlgmr.msra.gmra.mrb[8].mxu1 %vm47_vm0, %v1125_v34  ;;  %1005 = vmatpush1.bf16.msra.mxu0 %v1004_v1 }
  0x1f   :  { %1013 = vmatpush1.bf16.msra.mxu1 %v1012_v5  ;;  %308 = vmatprep.mubr.f32.mxu0 %v1035_v3 }
  0x20   :  { %397 = vmatprep.mubr.f32.mxu1 %v1035_v3  ;;  %1007 = vmatprep.subr.bf16.mxu0 %v1006_v6 }
  0x21   :  { %883 = vmatmul.mubr.msk.f32.gmra.mrb[10].mxu0 %vm47_vm0, %v1153_v45  ;;  %1015 = vmatprep.subr.bf16.mxu1 %v1014_v10 }
  0x22   :  { %887 = vmatmul.mubr.msk.f32.gmra.mrb[10].mxu1 %vm47_vm0, %v1153_v45  ;;  %314 = vmatprep.mubr.f32.mxu0 %v1035_v3 }
  0x23   :  { %403 = vmatprep.mubr.f32.mxu1 %v1035_v3  ;;  %1009 = vmatpush1.bf16.msra.mxu0 %v1008_v16 }
  0x24   :  { %1017 = vmatpush1.bf16.msra.mxu1 %v1016_v17  ;;  %1019 = vmatprep.subr.bf16.mxu0 %v1018_v18 }
  0x25   :  { %884 = vmatmul.mubr.msk.f32.gmra.mrb[12].mxu0 %vm47_vm0, %v1185_v57  ;;  %1027 = vmatprep.subr.bf16.mxu1 %v1026_v19 }
  0x26   :  { %888 = vmatmul.mubr.msk.f32.gmra.mrb[12].mxu1 %vm47_vm0, %v1185_v57  ;;  %320 = vmatprep.mubr.f32.mxu0 %v1035_v3 }
  0x27   :  { %409 = vmatprep.mubr.f32.mxu1 %v1035_v3 }
  0x29   :  { %885 = vmatmul.mubr.msk.f32.gmra.mrb[14].mxu0 %vm47_vm0, %v1196_v58 }
  0x2a   :  { %889 = vmatmul.mubr.msk.f32.gmra.mrb[14].mxu1 %vm47_vm0, %v1196_v58  ;;  %545 = vmatprep.mubr.f32.mxu0 %v1035_v3 }
  0x2b   :  { %634 = vmatprep.mubr.f32.mxu1 %v1035_v3 }
  0x2d   :  { %922 = vmatmul.mubr.msk.f32.vlgmr.msra.gmra.mrb[16].mxu0 %vm47_vm0, %v1125_v34 }
  0x2e   :  { %926 = vmatmul.mubr.msk.f32.vlgmr.msra.gmra.mrb[16].mxu1 %vm47_vm0, %v1125_v34  ;;  %1021 = vmatpush1.bf16.msra.mxu0 %v1020_v26 }
  0x2f   :  { %1029 = vmatpush1.bf16.msra.mxu1 %v1028_v29  ;;  %551 = vmatprep.mubr.f32.mxu0 %v1035_v3 }
  0x30   :  { %640 = vmatprep.mubr.f32.mxu1 %v1035_v3  ;;  %1023 = vmatprep.subr.bf16.mxu0 %v1022_v30 }
  0x31   :  { %923 = vmatmul.mubr.msk.f32.gmra.mrb[18].mxu0 %vm47_vm0, %v1153_v45  ;;  %1031 = vmatprep.subr.bf16.mxu1 %v1030_v33 }
  0x32   :  { %927 = vmatmul.mubr.msk.f32.gmra.mrb[18].mxu1 %vm47_vm0, %v1153_v45  ;;  %557 = vmatprep.mubr.f32.mxu0 %v1035_v3 }
  0x33   :  { %646 = vmatprep.mubr.f32.mxu1 %v1035_v3  ;;  %1025 = vmatpush1.bf16.msra.mxu0 %v1024_v37 }
  0x34   :  { %1033 = vmatpush1.bf16.msra.mxu1 %v1032_v38 }
  0x35   :  { %924 = vmatmul.mubr.msk.f32.gmra.mrb[20].mxu0 %vm47_vm0, %v1185_v57 }
  0x36   :  { %928 = vmatmul.mubr.msk.f32.gmra.mrb[20].mxu1 %vm47_vm0, %v1185_v57  ;;  %563 = vmatprep.mubr.f32.mxu0 %v1035_v3 }
  0x37   :  { %652 = vmatprep.mubr.f32.mxu1 %v1035_v3 }
  0x39   :  { %925 = vmatmul.mubr.msk.f32.gmra.mrb[22].mxu0 %vm47_vm0, %v1196_v58 }
  0x3a   :  { %929 = vmatmul.mubr.msk.f32.gmra.mrb[22].mxu1 %vm47_vm0, %v1196_v58  ;;  %723 = vmatprep.mubr.f32.mxu0 %v1035_v3 }
  0x3b   :  { %812 = vmatprep.mubr.f32.mxu1 %v1035_v3 }
  0x3d   :  { %930 = vmatmul.mubr.msk.f32.vlgmr.msra.gmra.mrb[24].mxu0 %vm47_vm0, %v1125_v34 }
  0x3e   :  { %934 = vmatmul.mubr.msk.f32.vlgmr.msra.gmra.mrb[24].mxu1 %vm47_vm0, %v1125_v34  ;;  %729 = vmatprep.mubr.f32.mxu0 %v1035_v3 }
  0x3f   :  { %818 = vmatprep.mubr.f32.mxu1 %v1035_v3 }
  0x41   :  { %931 = vmatmul.mubr.msk.f32.gmra.mrb[26].mxu0 %vm47_vm0, %v1153_v45 }
  0x42   :  { %935 = vmatmul.mubr.msk.f32.gmra.mrb[26].mxu1 %vm47_vm0, %v1153_v45  ;;  %735 = vmatprep.mubr.f32.mxu0 %v1035_v3 }
  0x43   :  { %824 = vmatprep.mubr.f32.mxu1 %v1035_v3 }
  0x45   :  { %932 = vmatmul.mubr.msk.f32.gmra.mrb[28].mxu0 %vm47_vm0, %v1185_v57 }
  0x46   :  { %936 = vmatmul.mubr.msk.f32.gmra.mrb[28].mxu1 %vm47_vm0, %v1185_v57  ;;  %741 = vmatprep.mubr.f32.mxu0 %v1035_v3 }
  0x47   :  { %830 = vmatprep.mubr.f32.mxu1 %v1035_v3 }
  0x49   :  { %933 = vmatmul.mubr.msk.f32.gmra.mrb[30].mxu0 %vm47_vm0, %v1196_v58 }
  0x4a   :  { %937 = vmatmul.mubr.msk.f32.gmra.mrb[30].mxu1 %vm47_vm0, %v1196_v58 }
  0xe0   :  { %v126_v34 = vpop.f32.mrb[0].mxu0 }
  0xe1   :  { %416 = vst [vmem:[%s1553_s2] sm:$0xff] %v126_v34  ;;  %v215_v39 = vpop.f32.mrb[0].mxu1  ;;  %v128_v40 = vpop.f32.mrb[1].mxu0 }
  0xe2   :  { %418 = vst [vmem:[%s1553_s2 + $0x10] sm:$0xff] %v215_v39  ;;  %417 = vst [vmem:[%s1553_s2 + $0x8] sm:$0xff] %v128_v40  ;;  %v217_v3 = vpop.f32.mrb[1].mxu1 }
  0xe3   :  { %419 = vst [vmem:[%s1553_s2 + $0x18] sm:$0xff] %v217_v3 }
  0xe4   :  { %v132_v41 = vpop.f32.mrb[2].mxu0 }
  0xe5   :  { %424 = vst [vmem:[%s1553_s2 + $0x40] sm:$0xff] %v132_v41  ;;  %v221_v42 = vpop.f32.mrb[2].mxu1  ;;  %v134_v43 = vpop.f32.mrb[3].mxu0 }
  0xe6   :  { %426 = vst [vmem:[%s1553_s2 + $0x50] sm:$0xff] %v221_v42  ;;  %425 = vst [vmem:[%s1553_s2 + $0x48] sm:$0xff] %v134_v43  ;;  %v223_v44 = vpop.f32.mrb[3].mxu1 }
  0xe7   :  { %427 = vst [vmem:[%s1553_s2 + $0x58] sm:$0xff] %v223_v44 }
  0xe8   :  { %v138_v45 = vpop.f32.mrb[4].mxu0 }
  0xe9   :  { %432 = vst [vmem:[%s1553_s2 + $0x80] sm:$0xff] %v138_v45  ;;  %v227_v46 = vpop.f32.mrb[4].mxu1  ;;  %v140_v47 = vpop.f32.mrb[5].mxu0 }
  0xea   :  { %434 = vst [vmem:[%s1553_s2 + $0x90] sm:$0xff] %v227_v46  ;;  %433 = vst [vmem:[%s1553_s2 + $0x88] sm:$0xff] %v140_v47  ;;  %v229_v48 = vpop.f32.mrb[5].mxu1 }
  0xeb   :  { %435 = vst [vmem:[%s1553_s2 + $0x98] sm:$0xff] %v229_v48 }
  0xec   :  { %v144_v49 = vpop.f32.mrb[6].mxu0 }
  0xed   :  { %440 = vst [vmem:[%s1553_s2 + $0xc0] sm:$0xff] %v144_v49  ;;  %v233_v50 = vpop.f32.mrb[6].mxu1  ;;  %v146_v51 = vpop.f32.mrb[7].mxu0 }
  0xee   :  { %442 = vst [vmem:[%s1553_s2 + $0xd0] sm:$0xff] %v233_v50  ;;  %441 = vst [vmem:[%s1553_s2 + $0xc8] sm:$0xff] %v146_v51  ;;  %v235_v52 = vpop.f32.mrb[7].mxu1 }
  0xef   :  { %443 = vst [vmem:[%s1553_s2 + $0xd8] sm:$0xff] %v235_v52 }
  0xf0   :  { %v304_v53 = vpop.f32.mrb[8].mxu0 }
  0xf1   :  { %420 = vst [vmem:[%s1553_s2 + $0x20] sm:$0xff] %v304_v53  ;;  %v393_v54 = vpop.f32.mrb[8].mxu1  ;;  %v306_v55 = vpop.f32.mrb[9].mxu0 }
  0xf2   :  { %422 = vst [vmem:[%s1553_s2 + $0x30] sm:$0xff] %v393_v54  ;;  %421 = vst [vmem:[%s1553_s2 + $0x28] sm:$0xff] %v306_v55  ;;  %v395_v56 = vpop.f32.mrb[9].mxu1 }
  0xf3   :  { %423 = vst [vmem:[%s1553_s2 + $0x38] sm:$0xff] %v395_v56 }
  0xf4   :  { %v310_v57 = vpop.f32.mrb[10].mxu0 }
  0xf5   :  { %428 = vst [vmem:[%s1553_s2 + $0x60] sm:$0xff] %v310_v57  ;;  %v399_v58 = vpop.f32.mrb[10].mxu1  ;;  %v312_v59 = vpop.f32.mrb[11].mxu0 }
  0xf6   :  { %430 = vst [vmem:[%s1553_s2 + $0x70] sm:$0xff] %v399_v58  ;;  %429 = vst [vmem:[%s1553_s2 + $0x68] sm:$0xff] %v312_v59  ;;  %v401_v60 = vpop.f32.mrb[11].mxu1 }
  0xf7   :  { %431 = vst [vmem:[%s1553_s2 + $0x78] sm:$0xff] %v401_v60 }
  0xf8   :  { %v316_v61 = vpop.f32.mrb[12].mxu0 }
  0xf9   :  { %436 = vst [vmem:[%s1553_s2 + $0xa0] sm:$0xff] %v316_v61  ;;  %v405_v62 = vpop.f32.mrb[12].mxu1  ;;  %v318_v63 = vpop.f32.mrb[13].mxu0 }
  0xfa   :  { %438 = vst [vmem:[%s1553_s2 + $0xb0] sm:$0xff] %v405_v62  ;;  %437 = vst [vmem:[%s1553_s2 + $0xa8] sm:$0xff] %v318_v63  ;;  %v407_v0 = vpop.f32.mrb[13].mxu1 }
  0xfb   :  { %439 = vst [vmem:[%s1553_s2 + $0xb8] sm:$0xff] %v407_v0 }
  0xfc   :  { %v322_v1 = vpop.f32.mrb[14].mxu0 }
  0xfd   :  { %444 = vst [vmem:[%s1553_s2 + $0xe0] sm:$0xff] %v322_v1  ;;  %v411_v2 = vpop.f32.mrb[14].mxu1  ;;  %v324_v4 = vpop.f32.mrb[15].mxu0 }
  0xfe   :  { %446 = vst [vmem:[%s1553_s2 + $0xf0] sm:$0xff] %v411_v2  ;;  %445 = vst [vmem:[%s1553_s2 + $0xe8] sm:$0xff] %v324_v4  ;;  %v413_v5 = vpop.f32.mrb[15].mxu1 }
  0xff   :  { %447 = vst [vmem:[%s1553_s2 + $0xf8] sm:$0xff] %v413_v5 }
 0x100   :  { %v547_v6 = vpop.f32.mrb[16].mxu0 }
 0x101   :  { %938 = vst [vmem:[%s1553_s2 + $0x100] sm:$0xff] %v547_v6  ;;  %v636_v7 = vpop.f32.mrb[16].mxu1  ;;  %v549_v8 = vpop.f32.mrb[17].mxu0 }
 0x102   :  { %940 = vst [vmem:[%s1553_s2 + $0x110] sm:$0xff] %v636_v7  ;;  %939 = vst [vmem:[%s1553_s2 + $0x108] sm:$0xff] %v549_v8  ;;  %v638_v9 = vpop.f32.mrb[17].mxu1 }
 0x103   :  { %941 = vst [vmem:[%s1553_s2 + $0x118] sm:$0xff] %v638_v9 }
 0x104   :  { %v553_v10 = vpop.f32.mrb[18].mxu0 }
 0x105   :  { %946 = vst [vmem:[%s1553_s2 + $0x140] sm:$0xff] %v553_v10  ;;  %v642_v11 = vpop.f32.mrb[18].mxu1  ;;  %v555_v12 = vpop.f32.mrb[19].mxu0 }
 0x106   :  { %948 = vst [vmem:[%s1553_s2 + $0x150] sm:$0xff] %v642_v11  ;;  %947 = vst [vmem:[%s1553_s2 + $0x148] sm:$0xff] %v555_v12  ;;  %v644_v13 = vpop.f32.mrb[19].mxu1 }
 0x107   :  { %949 = vst [vmem:[%s1553_s2 + $0x158] sm:$0xff] %v644_v13 }
 0x108   :  { %v559_v14 = vpop.f32.mrb[20].mxu0 }
 0x109   :  { %954 = vst [vmem:[%s1553_s2 + $0x180] sm:$0xff] %v559_v14  ;;  %v648_v15 = vpop.f32.mrb[20].mxu1  ;;  %v561_v16 = vpop.f32.mrb[21].mxu0 }
 0x10a   :  { %956 = vst [vmem:[%s1553_s2 + $0x190] sm:$0xff] %v648_v15  ;;  %955 = vst [vmem:[%s1553_s2 + $0x188] sm:$0xff] %v561_v16  ;;  %v650_v17 = vpop.f32.mrb[21].mxu1 }
 0x10b   :  { %957 = vst [vmem:[%s1553_s2 + $0x198] sm:$0xff] %v650_v17 }
 0x10c   :  { %v565_v18 = vpop.f32.mrb[22].mxu0 }
 0x10d   :  { %962 = vst [vmem:[%s1553_s2 + $0x1c0] sm:$0xff] %v565_v18  ;;  %v654_v19 = vpop.f32.mrb[22].mxu1  ;;  %v567_v20 = vpop.f32.mrb[23].mxu0 }
 0x10e   :  { %964 = vst [vmem:[%s1553_s2 + $0x1d0] sm:$0xff] %v654_v19  ;;  %963 = vst [vmem:[%s1553_s2 + $0x1c8] sm:$0xff] %v567_v20  ;;  %v656_v21 = vpop.f32.mrb[23].mxu1 }
 0x10f   :  { %965 = vst [vmem:[%s1553_s2 + $0x1d8] sm:$0xff] %v656_v21 }
 0x110   :  { %v725_v22 = vpop.f32.mrb[24].mxu0 }
 0x111   :  { %942 = vst [vmem:[%s1553_s2 + $0x120] sm:$0xff] %v725_v22  ;;  %v814_v23 = vpop.f32.mrb[24].mxu1  ;;  %v727_v24 = vpop.f32.mrb[25].mxu0 }
 0x112   :  { %944 = vst [vmem:[%s1553_s2 + $0x130] sm:$0xff] %v814_v23  ;;  %943 = vst [vmem:[%s1553_s2 + $0x128] sm:$0xff] %v727_v24  ;;  %v816_v25 = vpop.f32.mrb[25].mxu1 }
 0x113   :  { %945 = vst [vmem:[%s1553_s2 + $0x138] sm:$0xff] %v816_v25 }
 0x114   :  { %v731_v26 = vpop.f32.mrb[26].mxu0 }
 0x115   :  { %950 = vst [vmem:[%s1553_s2 + $0x160] sm:$0xff] %v731_v26  ;;  %v820_v27 = vpop.f32.mrb[26].mxu1  ;;  %v733_v28 = vpop.f32.mrb[27].mxu0 }
 0x116   :  { %952 = vst [vmem:[%s1553_s2 + $0x170] sm:$0xff] %v820_v27  ;;  %951 = vst [vmem:[%s1553_s2 + $0x168] sm:$0xff] %v733_v28  ;;  %v822_v29 = vpop.f32.mrb[27].mxu1 }
 0x117   :  { %953 = vst [vmem:[%s1553_s2 + $0x178] sm:$0xff] %v822_v29 }
 0x118   :  { %v737_v30 = vpop.f32.mrb[28].mxu0 }
 0x119   :  { %958 = vst [vmem:[%s1553_s2 + $0x1a0] sm:$0xff] %v737_v30  ;;  %v826_v31 = vpop.f32.mrb[28].mxu1  ;;  %v739_v32 = vpop.f32.mrb[29].mxu0 }
 0x11a   :  { %960 = vst [vmem:[%s1553_s2 + $0x1b0] sm:$0xff] %v826_v31  ;;  %959 = vst [vmem:[%s1553_s2 + $0x1a8] sm:$0xff] %v739_v32  ;;  %v828_v33 = vpop.f32.mrb[29].mxu1 }
 0x11b   :  { %961 = vst [vmem:[%s1553_s2 + $0x1b8] sm:$0xff] %v828_v33 }
 0x11c   :  { %v743_v35 = vpop.f32.mrb[30].mxu0 }
 0x11d   :  { %966 = vst [vmem:[%s1553_s2 + $0x1e0] sm:$0xff] %v743_v35  ;;  %v832_v36 = vpop.f32.mrb[30].mxu1  ;;  %v745_v37 = vpop.f32.mrb[31].mxu0 }
 0x11e   :  { %968 = vst [vmem:[%s1553_s2 + $0x1f0] sm:$0xff] %v832_v36  ;;  %967 = vst [vmem:[%s1553_s2 + $0x1e8] sm:$0xff] %v745_v37  ;;  %v834_v38 = vpop.f32.mrb[31].mxu1 }
 0x11f   :  { %969 = vst [vmem:[%s1553_s2 + $0x1f8] sm:$0xff] %v834_v38 }

</bundles_post_ra>
